<compile_context>
chip_gen: v6e
topology: v6e:2x2x1
jax: 0.10.0
libtpu: 0.0.40
codegen_flags: <defaults>
</compile_context>

<pallas_src>
import functools

import jax
import jax.numpy as jnp
from jax.experimental import pallas as pl
from jax.experimental.pallas import tpu as pltpu


def _mlp_embedder_kernel(x_ref, we_w_ref, we_b_ref,
                         w1_ref, b1_ref, w2_ref, b2_ref,
                         gamma_ref, beta_ref, out_ref,
                         *, num_units, eps, feat_dim):
    x = x_ref[...]                                                   # (tm, I)

    # Input embedding: X @ We + b  -> (tm, E), f32 MXU accumulation.
    h = jnp.dot(x, we_w_ref[...], preferred_element_type=jnp.float32) + we_b_ref[...]

    inv_e = 1.0 / float(feat_dim)

    # Static unroll over the (small) number of encoder units.
    for u in range(num_units):
        # MLP: Linear -> ReLU -> Linear
        hid = jnp.dot(h, w1_ref[u], preferred_element_type=jnp.float32) + b1_ref[u]
        hid = jnp.maximum(hid, 0.0)
        o = jnp.dot(hid, w2_ref[u], preferred_element_type=jnp.float32) + b2_ref[u]

        # Residual + LayerNorm over the feature (lane) dim.
        # Fused single-pass statistics: var = E[r^2] - mean^2.
        r = o + h
        s1 = jnp.sum(r, axis=-1, keepdims=True)
        s2 = jnp.sum(r * r, axis=-1, keepdims=True)
        mean = s1 * inv_e
        var = jnp.maximum(s2 * inv_e - mean * mean, 0.0)
        inv = jax.lax.rsqrt(var + eps)                               # EUP rsqrt
        h = (r - mean) * inv * gamma_ref[u] + beta_ref[u]
        # TODO(synk): nn.Dropout(p=0.3) is identity in eval/inference; not applied here.

    out_ref[...] = h.astype(out_ref.dtype)


def mlp_embedder(x, we_w, we_b, w1, b1, w2, b2, gamma, beta,
                 *, eps=1e-5, row_tile=1024):
    """Forward pass matching MLPEmbedder.forward (eval mode).

    Args:
      x:     (N, I) float32 input rows.
      we_w:  (I, E)  input-embedding weight (pre-transposed nn.Linear weight).
      we_b:  (1, E)  input-embedding bias.
      w1:    (U, E, H) first MLP weights per encoder unit (pre-transposed).
      b1:    (U, 1, H) first MLP biases.
      w2:    (U, H, E) second MLP weights per encoder unit (pre-transposed).
      b2:    (U, 1, E) second MLP biases.
      gamma: (U, 1, E) LayerNorm weights.
      beta:  (U, 1, E) LayerNorm biases.
    Returns:
      (N, E) float32 output.
    """
    N, I = x.shape
    E = we_w.shape[1]
    U, _, H = w1.shape

    # --- Row tiling: no host-side padding, ragged last tile masked by Pallas. ---
    if N <= row_tile:
        # Single tile; a block dim equal to the full array dim is always legal,
        # so any N (even not a multiple of 8) works without padding.
        tm = N
    else:
        n_tiles = pl.cdiv(N, row_tile)
        if n_tiles % 2 == 1:
            # Even tile count -> both TensorCores get work on v7x megacore.
            n_tiles += 1
        tm = pl.cdiv(N, n_tiles) * 8 // 8
        tm = pl.cdiv(pl.cdiv(N, n_tiles), 8) * 8          # round up to multiple of 8
    n_steps = pl.cdiv(N, tm)

    # --- Explicit VMEM budget (v5e scoped default is only 16 MiB). ---
    f32b = 4
    weight_bytes = f32b * (I * E + E + U * (E * H + H + H * E + E + 2 * E))
    tile_bytes = f32b * tm * (I + E)
    # Double-buffered tiles + resident weights (budget x2 for safety) + headroom.
    need = 2 * tile_bytes + 2 * weight_bytes
    vmem_limit = int(min(48 * 1024 * 1024, max(16 * 1024 * 1024, 3 * need)))

    kernel = functools.partial(_mlp_embedder_kernel, num_units=U, eps=eps, feat_dim=E)

    grid_spec = pltpu.PrefetchScalarGridSpec(
        num_scalar_prefetch=0,
        grid=(n_steps,),
        in_specs=[
            pl.BlockSpec((tm, I), lambda i: (i, 0)),       # X row tile
            pl.BlockSpec((I, E), lambda i: (0, 0)),        # We^T   (resident)
            pl.BlockSpec((1, E), lambda i: (0, 0)),        # We bias
            pl.BlockSpec((U, E, H), lambda i: (0, 0, 0)),  # W1^T stacked
            pl.BlockSpec((U, 1, H), lambda i: (0, 0, 0)),  # b1 stacked
            pl.BlockSpec((U, H, E), lambda i: (0, 0, 0)),  # W2^T stacked
            pl.BlockSpec((U, 1, E), lambda i: (0, 0, 0)),  # b2 stacked
            pl.BlockSpec((U, 1, E), lambda i: (0, 0, 0)),  # LayerNorm gamma
            pl.BlockSpec((U, 1, E), lambda i: (0, 0, 0)),  # LayerNorm beta
        ],
        out_specs=pl.BlockSpec((tm, E), lambda i: (i, 0)),
    )

    return pl.pallas_call(
        kernel,
        out_shape=jax.ShapeDtypeStruct((N, E), jnp.float32),
        grid_spec=grid_spec,
        compiler_params=pltpu.CompilerParams(
            dimension_semantics=("parallel",),
            vmem_limit_bytes=vmem_limit),
    )(x, we_w, we_b, w1, b1, w2, b2, gamma, beta)


def _reference(x, we_w, we_b, w1, b1, w2, b2, gamma, beta, eps=1e-5):
    """Pure-JAX reference matching the PyTorch MLPEmbedder (eval mode)."""
    h = x @ we_w + we_b
    for u in range(w1.shape[0]):
        hid = jnp.maximum(h @ w1[u] + b1[u], 0.0)
        o = hid @ w2[u] + b2[u]
        r = o + h
        mean = jnp.mean(r, axis=-1, keepdims=True)
        var = jnp.mean((r - mean) ** 2, axis=-1, keepdims=True)
        h = (r - mean) / jnp.sqrt(var + eps) * gamma[u] + beta[u]
    return h


if __name__ == "__main__":
    key = jax.random.PRNGKey(0)
    # batch=16, inp_dim=32, embed_dim=32, mlp_embed_factor=2, num_encoder_units=2
    B, I, E, F, U = 16, 32, 32, 2, 2
    H = E * F

    keys = jax.random.split(key, 10)
    x = jax.random.normal(keys[0], (B, I), dtype=jnp.float32)

    # Deterministic parameter init (nn.Linear weights stored transposed (in, out)).
    we_w = jax.random.normal(keys[1], (I, E), dtype=jnp.float32) / jnp.sqrt(I)
    we_b = jax.random.normal(keys[2], (1, E), dtype=jnp.float32) * 0.1
    w1 = jax.random.normal(keys[3], (U, E, H), dtype=jnp.float32) / jnp.sqrt(E)
    b1 = jax.random.normal(keys[4], (U, 1, H), dtype=jnp.float32) * 0.1
    w2 = jax.random.normal(keys[5], (U, H, E), dtype=jnp.float32) / jnp.sqrt(H)
    b2 = jax.random.normal(keys[6], (U, 1, E), dtype=jnp.float32) * 0.1
    gamma = 1.0 + 0.1 * jax.random.normal(keys[7], (U, 1, E), dtype=jnp.float32)
    beta = 0.1 * jax.random.normal(keys[8], (U, 1, E), dtype=jnp.float32)

    # Small-batch path: single grid step, whole batch fused into one matmul chain.
    out = mlp_embedder(x, we_w, we_b, w1, b1, w2, b2, gamma, beta)
    jax.block_until_ready(out)
    ref = _reference(x, we_w, we_b, w1, b1, w2, b2, gamma, beta)
    assert out.shape == (B, E)
    assert jnp.allclose(out, ref, atol=1e-4, rtol=1e-4), "MLPEmbedder mismatch"

    # Multi-tile path: balanced even number of row tiles, ragged last tile
    # handled by Pallas block masking (no host-side pad / slice).
    B2 = 300
    x2 = jax.random.normal(keys[9], (B2, I), dtype=jnp.float32)
    out2 = mlp_embedder(x2, we_w, we_b, w1, b1, w2, b2, gamma, beta, row_tile=128)
    jax.block_until_ready(out2)
    ref2 = _reference(x2, we_w, we_b, w1, b1, w2, b2, gamma, beta)
    assert out2.shape == (B2, E)
    assert jnp.allclose(out2, ref2, atol=1e-4, rtol=1e-4), "MLPEmbedder (tiled) mismatch"

    print("KERNEL_OK")
</pallas_src>

<mosaic_0001>
module attributes {stable_mosaic.version = 11 : i64} {
  func.func @_mlp_embedder_kernel(%arg0: i32, %arg1: memref<16x32xf32, #tpu.memory_space<vmem>>, %arg2: memref<32x32xf32, #tpu.memory_space<vmem>>, %arg3: memref<1x32xf32, #tpu.memory_space<vmem>>, %arg4: memref<2x32x64xf32, #tpu.memory_space<vmem>>, %arg5: memref<2x1x64xf32, #tpu.memory_space<vmem>>, %arg6: memref<2x64x32xf32, #tpu.memory_space<vmem>>, %arg7: memref<2x1x32xf32, #tpu.memory_space<vmem>>, %arg8: memref<2x1x32xf32, #tpu.memory_space<vmem>>, %arg9: memref<2x1x32xf32, #tpu.memory_space<vmem>>, %arg10: memref<16x32xf32, #tpu.memory_space<vmem>>) attributes {dimension_semantics = [#tpu.dimension_semantics<parallel>], iteration_bounds = array<i64: 1>, scalar_prefetch = 0 : i64, scratch_operands = 0 : i64, tpu.core_type = #tpu.core_type<tc>, window_params = [{transform_indices = @transform_0, window_bounds = array<i64: 16, 32>}, {pipeline_mode = #tpu.pipeline_mode<synchronous>, transform_indices = @transform_1, window_bounds = array<i64: 32, 32>}, {pipeline_mode = #tpu.pipeline_mode<synchronous>, transform_indices = @transform_2, window_bounds = array<i64: 1, 32>}, {pipeline_mode = #tpu.pipeline_mode<synchronous>, transform_indices = @transform_3, window_bounds = array<i64: 2, 32, 64>}, {pipeline_mode = #tpu.pipeline_mode<synchronous>, transform_indices = @transform_4, window_bounds = array<i64: 2, 1, 64>}, {pipeline_mode = #tpu.pipeline_mode<synchronous>, transform_indices = @transform_5, window_bounds = array<i64: 2, 64, 32>}, {pipeline_mode = #tpu.pipeline_mode<synchronous>, transform_indices = @transform_6, window_bounds = array<i64: 2, 1, 32>}, {pipeline_mode = #tpu.pipeline_mode<synchronous>, transform_indices = @transform_7, window_bounds = array<i64: 2, 1, 32>}, {pipeline_mode = #tpu.pipeline_mode<synchronous>, transform_indices = @transform_8, window_bounds = array<i64: 2, 1, 32>}, {transform_indices = @transform_9, window_bounds = array<i64: 16, 32>}]} {
    %c0 = arith.constant 0 : index
    %c0_0 = arith.constant 0 : index
    %0 = vector.load %arg1[%c0, %c0_0] : memref<16x32xf32, #tpu.memory_space<vmem>>, vector<16x32xf32>
    %c0_1 = arith.constant 0 : index
    %c0_2 = arith.constant 0 : index
    %1 = vector.load %arg2[%c0_1, %c0_2] : memref<32x32xf32, #tpu.memory_space<vmem>>, vector<32x32xf32>
    %cst = arith.constant dense<0.000000e+00> : vector<16x32xf32>
    %2 = tpu.matmul %0, %1, %cst {dimension_numbers = #tpu.dot_dimension_numbers<[1], [0], [0], [1], [0, 0, 1, 1], [], []>} : vector<16x32xf32>, vector<32x32xf32>, vector<16x32xf32> -> vector<16x32xf32>
    %c0_3 = arith.constant 0 : index
    %c0_4 = arith.constant 0 : index
    %3 = vector.load %arg3[%c0_3, %c0_4] : memref<1x32xf32, #tpu.memory_space<vmem>>, vector<1x32xf32>
    %4 = vector.broadcast %3 : vector<1x32xf32> to vector<16x32xf32>
    %5 = arith.addf %2, %4 : vector<16x32xf32>
    %c0_5 = arith.constant 0 : index
    %c0_6 = arith.constant 0 : index
    %c0_7 = arith.constant 0 : index
    %6 = vector.load %arg4[%c0_5, %c0_6, %c0_7] : memref<2x32x64xf32, #tpu.memory_space<vmem>>, vector<1x32x64xf32>
    %7 = vector.shape_cast %6 : vector<1x32x64xf32> to vector<32x64xf32>
    %cst_8 = arith.constant dense<0.000000e+00> : vector<16x64xf32>
    %8 = tpu.matmul %5, %7, %cst_8 {dimension_numbers = #tpu.dot_dimension_numbers<[1], [0], [0], [1], [0, 0, 1, 1], [], []>} : vector<16x32xf32>, vector<32x64xf32>, vector<16x64xf32> -> vector<16x64xf32>
    %c0_9 = arith.constant 0 : index
    %c0_10 = arith.constant 0 : index
    %c0_11 = arith.constant 0 : index
    %9 = vector.load %arg5[%c0_9, %c0_10, %c0_11] : memref<2x1x64xf32, #tpu.memory_space<vmem>>, vector<1x1x64xf32>
    %10 = vector.shape_cast %9 : vector<1x1x64xf32> to vector<1x64xf32>
    %11 = vector.broadcast %10 : vector<1x64xf32> to vector<16x64xf32>
    %12 = arith.addf %8, %11 : vector<16x64xf32>
    %cst_12 = arith.constant 0.000000e+00 : f32
    %13 = vector.broadcast %cst_12 : f32 to vector<16x64xf32>
    %14 = arith.maximumf %12, %13 : vector<16x64xf32>
    %c0_13 = arith.constant 0 : index
    %c0_14 = arith.constant 0 : index
    %c0_15 = arith.constant 0 : index
    %15 = vector.load %arg6[%c0_13, %c0_14, %c0_15] : memref<2x64x32xf32, #tpu.memory_space<vmem>>, vector<1x64x32xf32>
    %16 = vector.shape_cast %15 : vector<1x64x32xf32> to vector<64x32xf32>
    %cst_16 = arith.constant dense<0.000000e+00> : vector<16x32xf32>
    %17 = tpu.matmul %14, %16, %cst_16 {dimension_numbers = #tpu.dot_dimension_numbers<[1], [0], [0], [1], [0, 0, 1, 1], [], []>} : vector<16x64xf32>, vector<64x32xf32>, vector<16x32xf32> -> vector<16x32xf32>
    %c0_17 = arith.constant 0 : index
    %c0_18 = arith.constant 0 : index
    %c0_19 = arith.constant 0 : index
    %18 = vector.load %arg7[%c0_17, %c0_18, %c0_19] : memref<2x1x32xf32, #tpu.memory_space<vmem>>, vector<1x1x32xf32>
    %19 = vector.shape_cast %18 : vector<1x1x32xf32> to vector<1x32xf32>
    %20 = vector.broadcast %19 : vector<1x32xf32> to vector<16x32xf32>
    %21 = arith.addf %17, %20 : vector<16x32xf32>
    %22 = arith.addf %21, %5 : vector<16x32xf32>
    %cst_20 = arith.constant dense<0.000000e+00> : vector<16xf32>
    %23 = vector.multi_reduction <add>, %22, %cst_20 [1] : vector<16x32xf32> to vector<16xf32>
    %24 = vector.shape_cast %23 : vector<16xf32> to vector<16x1xf32>
    %25 = arith.mulf %22, %22 : vector<16x32xf32>
    %cst_21 = arith.constant dense<0.000000e+00> : vector<16xf32>
    %26 = vector.multi_reduction <add>, %25, %cst_21 [1] : vector<16x32xf32> to vector<16xf32>
    %27 = vector.shape_cast %26 : vector<16xf32> to vector<16x1xf32>
    %cst_22 = arith.constant 3.125000e-02 : f32
    %28 = vector.broadcast %cst_22 : f32 to vector<16x1xf32>
    %29 = arith.mulf %24, %28 : vector<16x1xf32>
    %cst_23 = arith.constant 3.125000e-02 : f32
    %30 = vector.broadcast %cst_23 : f32 to vector<16x1xf32>
    %31 = arith.mulf %27, %30 : vector<16x1xf32>
    %32 = arith.mulf %29, %29 : vector<16x1xf32>
    %33 = arith.subf %31, %32 : vector<16x1xf32>
    %cst_24 = arith.constant 0.000000e+00 : f32
    %34 = vector.broadcast %cst_24 : f32 to vector<16x1xf32>
    %35 = arith.maximumf %33, %34 : vector<16x1xf32>
    %cst_25 = arith.constant 9.99999974E-6 : f32
    %36 = vector.broadcast %cst_25 : f32 to vector<16x1xf32>
    %37 = arith.addf %35, %36 : vector<16x1xf32>
    %38 = math.rsqrt %37 : vector<16x1xf32>
    %39 = vector.broadcast %29 : vector<16x1xf32> to vector<16x32xf32>
    %40 = arith.subf %22, %39 : vector<16x32xf32>
    %41 = vector.broadcast %38 : vector<16x1xf32> to vector<16x32xf32>
    %42 = arith.mulf %40, %41 : vector<16x32xf32>
    %c0_26 = arith.constant 0 : index
    %c0_27 = arith.constant 0 : index
    %c0_28 = arith.constant 0 : index
    %43 = vector.load %arg8[%c0_26, %c0_27, %c0_28] : memref<2x1x32xf32, #tpu.memory_space<vmem>>, vector<1x1x32xf32>
    %44 = vector.shape_cast %43 : vector<1x1x32xf32> to vector<1x32xf32>
    %45 = vector.broadcast %44 : vector<1x32xf32> to vector<16x32xf32>
    %46 = arith.mulf %42, %45 : vector<16x32xf32>
    %c0_29 = arith.constant 0 : index
    %c0_30 = arith.constant 0 : index
    %c0_31 = arith.constant 0 : index
    %47 = vector.load %arg9[%c0_29, %c0_30, %c0_31] : memref<2x1x32xf32, #tpu.memory_space<vmem>>, vector<1x1x32xf32>
    %48 = vector.shape_cast %47 : vector<1x1x32xf32> to vector<1x32xf32>
    %49 = vector.broadcast %48 : vector<1x32xf32> to vector<16x32xf32>
    %50 = arith.addf %46, %49 : vector<16x32xf32>
    %c1 = arith.constant 1 : index
    %c0_32 = arith.constant 0 : index
    %c0_33 = arith.constant 0 : index
    %51 = vector.load %arg4[%c1, %c0_32, %c0_33] : memref<2x32x64xf32, #tpu.memory_space<vmem>>, vector<1x32x64xf32>
    %52 = vector.shape_cast %51 : vector<1x32x64xf32> to vector<32x64xf32>
    %cst_34 = arith.constant dense<0.000000e+00> : vector<16x64xf32>
    %53 = tpu.matmul %50, %52, %cst_34 {dimension_numbers = #tpu.dot_dimension_numbers<[1], [0], [0], [1], [0, 0, 1, 1], [], []>} : vector<16x32xf32>, vector<32x64xf32>, vector<16x64xf32> -> vector<16x64xf32>
    %c1_35 = arith.constant 1 : index
    %c0_36 = arith.constant 0 : index
    %c0_37 = arith.constant 0 : index
    %54 = vector.load %arg5[%c1_35, %c0_36, %c0_37] : memref<2x1x64xf32, #tpu.memory_space<vmem>>, vector<1x1x64xf32>
    %55 = vector.shape_cast %54 : vector<1x1x64xf32> to vector<1x64xf32>
    %56 = vector.broadcast %55 : vector<1x64xf32> to vector<16x64xf32>
    %57 = arith.addf %53, %56 : vector<16x64xf32>
    %cst_38 = arith.constant 0.000000e+00 : f32
    %58 = vector.broadcast %cst_38 : f32 to vector<16x64xf32>
    %59 = arith.maximumf %57, %58 : vector<16x64xf32>
    %c1_39 = arith.constant 1 : index
    %c0_40 = arith.constant 0 : index
    %c0_41 = arith.constant 0 : index
    %60 = vector.load %arg6[%c1_39, %c0_40, %c0_41] : memref<2x64x32xf32, #tpu.memory_space<vmem>>, vector<1x64x32xf32>
    %61 = vector.shape_cast %60 : vector<1x64x32xf32> to vector<64x32xf32>
    %cst_42 = arith.constant dense<0.000000e+00> : vector<16x32xf32>
    %62 = tpu.matmul %59, %61, %cst_42 {dimension_numbers = #tpu.dot_dimension_numbers<[1], [0], [0], [1], [0, 0, 1, 1], [], []>} : vector<16x64xf32>, vector<64x32xf32>, vector<16x32xf32> -> vector<16x32xf32>
    %c1_43 = arith.constant 1 : index
    %c0_44 = arith.constant 0 : index
    %c0_45 = arith.constant 0 : index
    %63 = vector.load %arg7[%c1_43, %c0_44, %c0_45] : memref<2x1x32xf32, #tpu.memory_space<vmem>>, vector<1x1x32xf32>
    %64 = vector.shape_cast %63 : vector<1x1x32xf32> to vector<1x32xf32>
    %65 = vector.broadcast %64 : vector<1x32xf32> to vector<16x32xf32>
    %66 = arith.addf %62, %65 : vector<16x32xf32>
    %67 = arith.addf %66, %50 : vector<16x32xf32>
    %cst_46 = arith.constant dense<0.000000e+00> : vector<16xf32>
    %68 = vector.multi_reduction <add>, %67, %cst_46 [1] : vector<16x32xf32> to vector<16xf32>
    %69 = vector.shape_cast %68 : vector<16xf32> to vector<16x1xf32>
    %70 = arith.mulf %67, %67 : vector<16x32xf32>
    %cst_47 = arith.constant dense<0.000000e+00> : vector<16xf32>
    %71 = vector.multi_reduction <add>, %70, %cst_47 [1] : vector<16x32xf32> to vector<16xf32>
    %72 = vector.shape_cast %71 : vector<16xf32> to vector<16x1xf32>
    %cst_48 = arith.constant 3.125000e-02 : f32
    %73 = vector.broadcast %cst_48 : f32 to vector<16x1xf32>
    %74 = arith.mulf %69, %73 : vector<16x1xf32>
    %cst_49 = arith.constant 3.125000e-02 : f32
    %75 = vector.broadcast %cst_49 : f32 to vector<16x1xf32>
    %76 = arith.mulf %72, %75 : vector<16x1xf32>
    %77 = arith.mulf %74, %74 : vector<16x1xf32>
    %78 = arith.subf %76, %77 : vector<16x1xf32>
    %cst_50 = arith.constant 0.000000e+00 : f32
    %79 = vector.broadcast %cst_50 : f32 to vector<16x1xf32>
    %80 = arith.maximumf %78, %79 : vector<16x1xf32>
    %cst_51 = arith.constant 9.99999974E-6 : f32
    %81 = vector.broadcast %cst_51 : f32 to vector<16x1xf32>
    %82 = arith.addf %80, %81 : vector<16x1xf32>
    %83 = math.rsqrt %82 : vector<16x1xf32>
    %84 = vector.broadcast %74 : vector<16x1xf32> to vector<16x32xf32>
    %85 = arith.subf %67, %84 : vector<16x32xf32>
    %86 = vector.broadcast %83 : vector<16x1xf32> to vector<16x32xf32>
    %87 = arith.mulf %85, %86 : vector<16x32xf32>
    %c1_52 = arith.constant 1 : index
    %c0_53 = arith.constant 0 : index
    %c0_54 = arith.constant 0 : index
    %88 = vector.load %arg8[%c1_52, %c0_53, %c0_54] : memref<2x1x32xf32, #tpu.memory_space<vmem>>, vector<1x1x32xf32>
    %89 = vector.shape_cast %88 : vector<1x1x32xf32> to vector<1x32xf32>
    %90 = vector.broadcast %89 : vector<1x32xf32> to vector<16x32xf32>
    %91 = arith.mulf %87, %90 : vector<16x32xf32>
    %c1_55 = arith.constant 1 : index
    %c0_56 = arith.constant 0 : index
    %c0_57 = arith.constant 0 : index
    %92 = vector.load %arg9[%c1_55, %c0_56, %c0_57] : memref<2x1x32xf32, #tpu.memory_space<vmem>>, vector<1x1x32xf32>
    %93 = vector.shape_cast %92 : vector<1x1x32xf32> to vector<1x32xf32>
    %94 = vector.broadcast %93 : vector<1x32xf32> to vector<16x32xf32>
    %95 = arith.addf %91, %94 : vector<16x32xf32>
    %c0_58 = arith.constant 0 : index
    %c0_59 = arith.constant 0 : index
    %96 = vector.load %arg10[%c0_58, %c0_59] : memref<16x32xf32, #tpu.memory_space<vmem>>, vector<16x32xf32>
    tpu.vector_store %arg10[%c0_58, %c0_59], %95 {strides = array<i32>} : memref<16x32xf32, #tpu.memory_space<vmem>>, vector<16x32xf32>,
    return
  }
  func.func @transform_0(%arg0: i32) -> (i32, i32) {
    %c0_i32 = arith.constant 0 : i32
    %c0_i32_0 = arith.constant 0 : i32
    return %arg0, %c0_i32 : i32, i32
  }
  func.func @transform_1(%arg0: i32) -> (i32, i32) {
    %c0_i32 = arith.constant 0 : i32
    %c0_i32_0 = arith.constant 0 : i32
    %c0_i32_1 = arith.constant 0 : i32
    return %c0_i32, %c0_i32_0 : i32, i32
  }
  func.func @transform_2(%arg0: i32) -> (i32, i32) {
    %c0_i32 = arith.constant 0 : i32
    %c0_i32_0 = arith.constant 0 : i32
    %c0_i32_1 = arith.constant 0 : i32
    return %c0_i32, %c0_i32_0 : i32, i32
  }
  func.func @transform_3(%arg0: i32) -> (i32, i32, i32) {
    %c0_i32 = arith.constant 0 : i32
    %c0_i32_0 = arith.constant 0 : i32
    %c0_i32_1 = arith.constant 0 : i32
    %c0_i32_2 = arith.constant 0 : i32
    return %c0_i32, %c0_i32_0, %c0_i32_1 : i32, i32, i32
  }
  func.func @transform_4(%arg0: i32) -> (i32, i32, i32) {
    %c0_i32 = arith.constant 0 : i32
    %c0_i32_0 = arith.constant 0 : i32
    %c0_i32_1 = arith.constant 0 : i32
    %c0_i32_2 = arith.constant 0 : i32
    return %c0_i32, %c0_i32_0, %c0_i32_1 : i32, i32, i32
  }
  func.func @transform_5(%arg0: i32) -> (i32, i32, i32) {
    %c0_i32 = arith.constant 0 : i32
    %c0_i32_0 = arith.constant 0 : i32
    %c0_i32_1 = arith.constant 0 : i32
    %c0_i32_2 = arith.constant 0 : i32
    return %c0_i32, %c0_i32_0, %c0_i32_1 : i32, i32, i32
  }
  func.func @transform_6(%arg0: i32) -> (i32, i32, i32) {
    %c0_i32 = arith.constant 0 : i32
    %c0_i32_0 = arith.constant 0 : i32
    %c0_i32_1 = arith.constant 0 : i32
    %c0_i32_2 = arith.constant 0 : i32
    return %c0_i32, %c0_i32_0, %c0_i32_1 : i32, i32, i32
  }
  func.func @transform_7(%arg0: i32) -> (i32, i32, i32) {
    %c0_i32 = arith.constant 0 : i32
    %c0_i32_0 = arith.constant 0 : i32
    %c0_i32_1 = arith.constant 0 : i32
    %c0_i32_2 = arith.constant 0 : i32
    return %c0_i32, %c0_i32_0, %c0_i32_1 : i32, i32, i32
  }
  func.func @transform_8(%arg0: i32) -> (i32, i32, i32) {
    %c0_i32 = arith.constant 0 : i32
    %c0_i32_0 = arith.constant 0 : i32
    %c0_i32_1 = arith.constant 0 : i32
    %c0_i32_2 = arith.constant 0 : i32
    return %c0_i32, %c0_i32_0, %c0_i32_1 : i32, i32, i32
  }
  func.func @transform_9(%arg0: i32) -> (i32, i32) {
    %c0_i32 = arith.constant 0 : i32
    %c0_i32_0 = arith.constant 0 : i32
    return %arg0, %c0_i32 : i32, i32
  }
}

</mosaic_0001>

<bundles_post_ra>
// kernel: tpu_custom_call.1
= control target key start
LH: loop header
LB: loop body
LE: loop exit
PB: predicated region body
PF: predicated region fallthrough
CT: control target
= control target key end

     0   :  { %vm46_vm0 = vcmask 261120   ;;  %s1007_s0 = inlined_call_operand.vmem [shape: f32[16,32], index: 0, kind: input, shape index: {}]   ;;  %s1008_s1 = inlined_call_operand.vmem [shape: f32[32,32], index: 1, kind: input, shape index: {}]   ;;  %s1009_s2 = inlined_call_operand.vmem [shape: f32[1,32], index: 2, kind: input, shape index: {}]   ;;  %s1010_s3 = inlined_call_operand.vmem [shape: f32[2,32,64], index: 3, kind: input, shape index: {}]   ;;  %s1011_s4 = inlined_call_operand.vmem [shape: f32[2,1,64], index: 4, kind: input, shape index: {}]   ;;  %s1012_s5 = inlined_call_operand.vmem [shape: f32[2,64,32], index: 5, kind: input, shape index: {}]   ;;  %s1013_s6 = inlined_call_operand.vmem [shape: f32[2,1,32], index: 6, kind: input, shape index: {}]   ;;  %s1014_s7 = inlined_call_operand.vmem [shape: f32[2,1,32], index: 7, kind: input, shape index: {}]   ;;  %s1015_s8 = inlined_call_operand.vmem [shape: f32[2,1,32], index: 8, kind: input, shape index: {}]   ;;  %s1016_s9 = inlined_call_operand.hbm [shape: f32[16,32], index: 9, kind: output, shape index: {}]  }
   0x1   :  { %v38_v0 = vld [vmem:[%s1008_s1 + $0x18] sm:$0xff]  ;;  %v37_v1 = vld [vmem:[%s1008_s1 + $0x10] sm:$0xff]  ;;  %v33_v2 = vld [vmem:[%s1007_s0] sm:$0xff] }
   0x2   :  { %710 = vmatprep.subr.mxu0 %v38_v0  ;;  %v36_v3 = vld [vmem:[%s1008_s1 + $0x8] sm:$0xff]  ;;  %718 = vmatprep.mubr.msk.f32.mxu0 %vm46_vm0, %v33_v2  ;;  %v131_v4 = vld [vmem:[%s1010_s3 + $0x18] sm:$0xff] }
   0x3   :  { %711 = vmatpush3.msra.mxu0 %v38_v0 }
   0x4   :  { %14 = vsyncpa [#allocation3], 0  ;;  %712 = vmatprep.subr.mxu0 %v37_v1  ;;  %721 = vmatprep.subr.mxu1 %v131_v4  ;;  %v35_v5 = vld [vmem:[%s1008_s1] sm:$0xff]  ;;  %v34_v6 = vld [vmem:[%s1007_s0 + $0x8] sm:$0xff]  ;;  %vm237_vm1 = vcmask 523264   ;;  %s814_s12 = smov [#allocation2]  }
   0x5   :  { %713 = vmatpush3.msra.mxu0 %v37_v1  ;;  %722 = vmatpush3.msra.mxu1 %v131_v4  ;;  %v130_v7 = vld [vmem:[%s1010_s3 + $0x10] sm:$0xff]  ;;  %v129_v8 = vld [vmem:[%s1010_s3 + $0x8] sm:$0xff]  ;;  %v128_v9 = vld [vmem:[%s1010_s3] sm:$0xff]  ;;  %s626_s13 = sshll.u32 %s814_s12, 4  ;;  %s627_s13 = int_to_ptr.vmem [resolvable:$true] %s626_s13 }
   0x6   :  { %714 = vmatprep.subr.mxu0 %v36_v3  ;;  %723 = vmatprep.subr.mxu1 %v130_v7  ;;  %v229_v10 = vld [vmem:[%s1012_s5 + $0x38] sm:$0xff]  ;;  %v228_v11 = vld [vmem:[%s1012_s5 + $0x30] sm:$0xff]  ;;  %v227_v12 = vld [vmem:[%s1012_s5 + $0x28] sm:$0xff]  ;;  %p797_p1 = scmp.lt.s32.totalorder %s627_s13, %s627_s13 }
   0x7   :  { %715 = vmatpush3.msra.mxu0 %v36_v3  ;;  %724 = vmatpush3.msra.mxu1 %v130_v7  ;;  %v226_v13 = vld [vmem:[%s1012_s5 + $0x20] sm:$0xff]  ;;  %v225_v19 = vld [vmem:[%s1012_s5 + $0x18] sm:$0xff]  ;;  %v224_v20 = vld [vmem:[%s1012_s5 + $0x10] sm:$0xff] }
   0x8   :  { %716 = vmatprep.subr.mxu0 %v35_v5  ;;  %725 = vmatprep.subr.mxu1 %v129_v8  ;;  %v637_v15 = vld [vmem:[%s1009_s2] ss:$0 sm:$0xff]  ;;  %v223_v21 = vld [vmem:[%s1012_s5 + $0x8] sm:$0xff]  ;;  %v651_v43 = vld [vmem:[%s1010_s3 + $0x38] sm:$0xff] }
   0x9   :  { %717 = vmatpush3.msra.mxu0 %v35_v5  ;;  %726 = vmatpush3.msra.mxu1 %v129_v8  ;;  %v222_v22 = vld [vmem:[%s1012_s5] sm:$0xff]  ;;  %v650_v44 = vld [vmem:[%s1010_s3 + $0x30] sm:$0xff]  ;;  %v649_v45 = vld [vmem:[%s1010_s3 + $0x28] sm:$0xff] }
   0xa   :  { %719 = vmatmul.mubr.msk.f32.vlgmr.msra.gmra.mxu0 %vm46_vm0, %v34_v6  ;;  %727 = vmatprep.subr.mxu1 %v128_v9  ;;  %v640_v23 = vld [vmem:[%s1011_s4] ss:$0 sm:$0xff]  ;;  %v663_v47 = vld [vmem:[%s1012_s5 + $0x78] sm:$0xff] }
   0xb   :  { %728 = vmatpush3.msra.mxu1 %v128_v9  ;;  %732 = vmatprep.subr.mxu0 %v229_v10  ;;  %v643_v30 = vld [vmem:[%s1013_s6] ss:$0 sm:$0xff] }
   0xc   :  { %733 = vmatpush3.msra.mxu0 %v229_v10  ;;  %751 = vmatprep.subr.mxu1 %v651_v43  ;;  %v648_v46 = vld [vmem:[%s1010_s3 + $0x20] sm:$0xff] }
   0xd   :  { %734 = vmatprep.subr.mxu0 %v228_v11  ;;  %v646_v2 = vld [vmem:[%s1014_s7] ss:$0 sm:$0xff] }
   0xe   :  { %735 = vmatpush3.msra.mxu0 %v228_v11  ;;  %v647_v4 = vld [vmem:[%s1015_s8] ss:$0 sm:$0xff] }
   0xf   :  { %736 = vmatprep.subr.mxu0 %v227_v12 }
  0x10   :  { %737 = vmatpush3.msra.mxu0 %v227_v12  ;;  %v662_v12 = vld [vmem:[%s1012_s5 + $0x70] sm:$0xff] }
  0x11   :  { %738 = vmatprep.subr.mxu0 %v226_v13 }
  0x12   :  { %739 = vmatpush3.msra.mxu0 %v226_v13  ;;  %v661_v13 = vld [vmem:[%s1012_s5 + $0x68] sm:$0xff] }
  0x13   :  { %740 = vmatprep.subr.mxu0 %v225_v19 }
  0x14   :  { %741 = vmatpush3.msra.mxu0 %v225_v19  ;;  %v653_v19 = vld [vmem:[%s1011_s4 + $0x1] ss:$0 sm:$0xff] }
  0x15   :  { %742 = vmatprep.subr.mxu0 %v224_v20 }
  0x16   :  { %743 = vmatpush3.msra.mxu0 %v224_v20 }
  0x17   :  { %744 = vmatprep.subr.mxu0 %v223_v21 }
  0x18   :  { %745 = vmatpush3.msra.mxu0 %v223_v21 }
  0x19   :  { %746 = vmatprep.subr.mxu0 %v222_v22 }
  0x1a   :  { %747 = vmatpush3.msra.mxu0 %v222_v22 }
  0xca   :  { %v720_v14 = vpop.f32.mrf.mxu0 }
  0xcb   :  { %v125_v18 = vadd.f32 %v720_v14, %v637_v15  ;;  %v660_v14 = vld [vmem:[%s1012_s5 + $0x60] sm:$0xff] }
  0xcc   :  { %v119_v16 = vpop.f32.mrf.mxu0 }
  0xcd   :  { %v120_v17 = vadd.f32 %v637_v15, %v119_v16  ;;  %v659_v15 = vld [vmem:[%s1012_s5 + $0x58] sm:$0xff]  ;;  %v658_v16 = vld [vmem:[%s1012_s5 + $0x50] sm:$0xff] }
  0xcf   :  { %729 = vmatprep.mubr.msk.f32.mxu1 %vm46_vm0, %v120_v17 }
  0xd0   :  { %730 = vmatmul.mubr.msk.f32.vlgmr.msra.gmra.mxu1 %vm46_vm0, %v125_v18 }
  0xd1   :  { %752 = vmatpush3.msra.mxu1 %v651_v43 }
  0xd2   :  { %753 = vmatprep.subr.mxu1 %v650_v44 }
  0xd3   :  { %754 = vmatpush3.msra.mxu1 %v650_v44 }
  0xd4   :  { %755 = vmatprep.subr.mxu1 %v649_v45 }
  0xd5   :  { %756 = vmatpush3.msra.mxu1 %v649_v45 }
  0xd6   :  { %757 = vmatprep.subr.mxu1 %v648_v46 }
  0xd7   :  { %758 = vmatpush3.msra.mxu1 %v648_v46 }
  0xd8   :  { %762 = vmatprep.subr.mxu1 %v663_v47 }
 0x190   :  { %v731_v24 = vpop.f32.mrf.mxu1 }
 0x191   :  { %v217_v25 = vadd.f32 %v731_v24, %v640_v23 }
 0x192   :  { %v211_v26 = vpop.f32.mrf.mxu1 }
 0x193   :  { %v212_v27 = vadd.f32 %v640_v23, %v211_v26  ;;  %v221_v29 = vmax.f32 %v217_v25, 0.0  ;;  %v665_v26 = vld [vmem:[%s1013_s6 + $0x1] ss:$0 sm:$0xff] }
 0x195   :  { %v220_v28 = vmax.f32 %v212_v27, 0.0 }
 0x197   :  { %748 = vmatprep.mubr.msk.f32.mxu0 %vm237_vm1, %v220_v28 }
 0x198   :  { %749 = vmatmul.mubr.msk.f32.vlgmr.msra.gmra.mxu0 %vm237_vm1, %v221_v29 }
 0x258   :  { %v750_v31 = vpop.f32.mrf.mxu0 }
 0x259   :  { %v316_v32 = vadd.f32 %v750_v31, %v643_v30 }
 0x25a   :  { %v310_v33 = vpop.f32.mrf.mxu0 }
 0x25b   :  { %v311_v34 = vadd.f32 %v643_v30, %v310_v33  ;;  %v320_v35 = vadd.f32 %v316_v32, %v125_v18  ;;  %v656_v18 = vld [vmem:[%s1012_s5 + $0x40] sm:$0xff] }
 0x25d   :  { %v319_v36 = vadd.f32 %v311_v34, %v120_v17  ;;  %v328_v40 = vmul.f32 %v320_v35, %v320_v35  ;;  %v324_v41 = vsel %vm46_vm0, %v320_v35, 0.0  ;;  %v657_v17 = vld [vmem:[%s1012_s5 + $0x48] sm:$0xff] }
 0x25f   :  { %v321_v37 = vsel %vm46_vm0, %v319_v36, 0.0  ;;  %v327_v38 = vmul.f32 %v319_v36, %v319_v36  ;;  %v332_v42 = vsel %vm46_vm0, %v328_v40, 0.0 }
 0x260   :  { %322 = vadd.xlane.f32.xlu0 %v321_v37 }
 0x261   :  { %v329_v39 = vsel %vm46_vm0, %v327_v38, 0.0 }
 0x262   :  { %330 = vadd.xlane.f32.xlu1 %v329_v39 }
 0x264   :  { %325 = vadd.xlane.f32.xlu0 %v324_v41 }
 0x266   :  { %333 = vadd.xlane.f32.xlu1 %v332_v42 }
 0x2e9   :  { %v323_v48 = vpop.xlane.xlu0 %322 }
 0x2ea   :  { %v335_v49 = vmul.f32 0.03125, %v323_v48 }
 0x2eb   :  { %v331_v50 = vpop.xlane.xlu1 %330 }
 0x2ec   :  { %v339_v51 = vmul.f32 %v335_v49, %v335_v49  ;;  %v337_v52 = vmul.f32 0.03125, %v331_v50  ;;  %v349_v0 = vsub.f32 %v319_v36, %v335_v49 }
 0x2ed   :  { %v326_v53 = vpop.xlane.xlu0 %325 }
 0x2ee   :  { %v341_v54 = vsub.f32 %v337_v52, %v339_v51  ;;  %v336_v55 = vmul.f32 0.03125, %v326_v53 }
 0x2ef   :  { %v334_v56 = vpop.xlane.xlu1 %333 }
 0x2f0   :  { %v343_v57 = vmax.f32 %v341_v54, 0.0  ;;  %v340_v58 = vmul.f32 %v336_v55, %v336_v55  ;;  %v338_v59 = vmul.f32 0.03125, %v334_v56  ;;  %v350_v5 = vsub.f32 %v320_v35, %v336_v55 }
 0x2f2   :  { %v345_v60 = vadd.f32 1e-05, %v343_v57  ;;  %v342_v61 = vsub.f32 %v338_v59, %v340_v58  ;;  %v669_v57 = vld [vmem:[%s1014_s7 + $0x1] ss:$0 sm:$0xff]  ;;  %s792_s7 = scalar_lea.vmem %s627_s13, 256 }
 0x2f3   :  { %p793_p0 = scmp.ne.s32.totalorder %s627_s13, %s792_s7  ;;  %p798_p2 = scmp.lt.s32.totalorder %s792_s7, %s792_s7 }
 0x2f4   :  { %784 = vrsqrt.f32 %v345_v60  ;;  %v344_v62 = vmax.f32 %v342_v61, 0.0  ;;  %v671_v61 = vld [vmem:[%s1015_s8 + $0x1] ss:$0 sm:$0xff] }
 0x2f5   :  { %p799_p3 = por %p798_p2, %p797_p1 }
 0x2f6   :  { %v346_v63 = vadd.f32 1e-05, %v344_v62 }
 0x2f7   :  { %p800_p4 = pnand %p799_p3, %p793_p0 }
 0x2f8   :  { %786 = vrsqrt.f32 %v346_v63 }
 0x301   :  { %v785_v1 = vpop.eup %784 }
 0x302   :  { %v351_v3 = vmul.f32 %v785_v1, %v349_v0 }
 0x304   :  { %v360_v6 = vmul.f32 %v646_v2, %v351_v3 }
 0x305   :  { %v787_v7 = vpop.eup %786 }
 0x306   :  { %v352_v8 = vmul.f32 %v787_v7, %v350_v5  ;;  %v369_v9 = vadd.f32 %v647_v4, %v360_v6 }
 0x308   :  { %v361_v10 = vmul.f32 %v646_v2, %v352_v8  ;;  %759 = vmatprep.mubr.msk.f32.mxu1 %vm46_vm0, %v369_v9 }
 0x30a   :  { %v370_v11 = vadd.f32 %v647_v4, %v361_v10 }
 0x30c   :  { %760 = vmatmul.mubr.msk.f32.vlgmr.msra.gmra.mxu1 %vm46_vm0, %v370_v11 }
 0x30d   :  { %763 = vmatpush3.msra.mxu1 %v663_v47 }
 0x30e   :  { %764 = vmatprep.subr.mxu1 %v662_v12 }
 0x30f   :  { %765 = vmatpush3.msra.mxu1 %v662_v12 }
 0x310   :  { %766 = vmatprep.subr.mxu1 %v661_v13 }
 0x311   :  { %767 = vmatpush3.msra.mxu1 %v661_v13 }
 0x312   :  { %768 = vmatprep.subr.mxu1 %v660_v14 }
 0x313   :  { %769 = vmatpush3.msra.mxu1 %v660_v14 }
 0x314   :  { %770 = vmatprep.subr.mxu1 %v659_v15 }
 0x315   :  { %771 = vmatpush3.msra.mxu1 %v659_v15 }
 0x316   :  { %772 = vmatprep.subr.mxu1 %v658_v16 }
 0x317   :  { %773 = vmatpush3.msra.mxu1 %v658_v16 }
 0x318   :  { %774 = vmatprep.subr.mxu1 %v657_v17 }
 0x319   :  { %775 = vmatpush3.msra.mxu1 %v657_v17 }
 0x31a   :  { %776 = vmatprep.subr.mxu1 %v656_v18 }
 0x31b   :  { %777 = vmatpush3.msra.mxu1 %v656_v18 }
 0x3cc   :  { %v761_v20 = vpop.f32.mrf.mxu1 }
 0x3cd   :  { %v462_v21 = vadd.f32 %v761_v20, %v653_v19 }
 0x3ce   :  { %v456_v22 = vpop.f32.mrf.mxu1 }
 0x3cf   :  { %v457_v23 = vadd.f32 %v653_v19, %v456_v22  ;;  %v466_v25 = vmax.f32 %v462_v21, 0.0 }
 0x3d1   :  { %v465_v24 = vmax.f32 %v457_v23, 0.0 }
 0x3d3   :  { %778 = vmatprep.mubr.msk.f32.mxu1 %vm237_vm1, %v465_v24 }
 0x3d4   :  { %779 = vmatmul.mubr.msk.f32.vlgmr.msra.gmra.mxu1 %vm237_vm1, %v466_v25 }
 0x494   :  { %v780_v27 = vpop.f32.mrf.mxu1 }
 0x495   :  { %v562_v28 = vadd.f32 %v780_v27, %v665_v26 }
 0x496   :  { %v556_v29 = vpop.f32.mrf.mxu1 }
 0x497   :  { %v566_v30 = vadd.f32 %v562_v28, %v370_v11  ;;  %v557_v31 = vadd.f32 %v665_v26, %v556_v29 }
 0x499   :  { %v565_v32 = vadd.f32 %v557_v31, %v369_v9  ;;  %v570_v33 = vsel %vm46_vm0, %v566_v30, 0.0  ;;  %v574_v34 = vmul.f32 %v566_v30, %v566_v30 }
 0x49a   :  { %571 = vadd.xlane.f32.xlu1 %v570_v33 }
 0x49b   :  { %v567_v35 = vsel %vm46_vm0, %v565_v32, 0.0  ;;  %v573_v36 = vmul.f32 %v565_v32, %v565_v32  ;;  %v578_v37 = vsel %vm46_vm0, %v574_v34, 0.0 }
 0x49c   :  { %568 = vadd.xlane.f32.xlu0 %v567_v35 }
 0x49d   :  { %v575_v38 = vsel %vm46_vm0, %v573_v36, 0.0 }
 0x49e   :  { %579 = vadd.xlane.f32.xlu1 %v578_v37 }
 0x4a0   :  { %576 = vadd.xlane.f32.xlu0 %v575_v38 }
 0x523   :  { %v572_v39 = vpop.xlane.xlu1 %571 }
 0x524   :  { %v582_v40 = vmul.f32 0.03125, %v572_v39 }
 0x525   :  { %v569_v41 = vpop.xlane.xlu0 %568 }
 0x526   :  { %v581_v42 = vmul.f32 0.03125, %v569_v41  ;;  %v586_v44 = vmul.f32 %v582_v40, %v582_v40  ;;  %v596_v55 = vsub.f32 %v566_v30, %v582_v40 }
 0x527   :  { %v580_v43 = vpop.xlane.xlu1 %579 }
 0x528   :  { %v584_v45 = vmul.f32 0.03125, %v580_v43  ;;  %v585_v47 = vmul.f32 %v581_v42, %v581_v42  ;;  %v595_v58 = vsub.f32 %v565_v32, %v581_v42 }
 0x529   :  { %v577_v46 = vpop.xlane.xlu0 %576 }
 0x52a   :  { %v588_v48 = vsub.f32 %v584_v45, %v586_v44  ;;  %v583_v49 = vmul.f32 0.03125, %v577_v46 }
 0x52c   :  { %v590_v50 = vmax.f32 %v588_v48, 0.0  ;;  %v587_v51 = vsub.f32 %v583_v49, %v585_v47 }
 0x52e   :  { %v592_v52 = vadd.f32 1e-05, %v590_v50  ;;  %v589_v53 = vmax.f32 %v587_v51, 0.0 }
 0x530   :  { %788 = vrsqrt.f32 %v592_v52  ;;  %v591_v54 = vadd.f32 1e-05, %v589_v53 }
 0x532   :  { %790 = vrsqrt.f32 %v591_v54 }
 0x53d   :  { %v789_v56 = vpop.eup %788 }
 0x53e   :  { %v598_v59 = vmul.f32 %v789_v56, %v596_v55 }
 0x53f   :  { %v791_v60 = vpop.eup %790 }
 0x540   :  { %v597_v62 = vmul.f32 %v791_v60, %v595_v58  ;;  %v608_v63 = vmul.f32 %v669_v57, %v598_v59 }
 0x542   :  { %v607_v0 = vmul.f32 %v669_v57, %v597_v62  ;;  %v618_v1 = vadd.f32 %v671_v61, %v608_v63 }
 0x544   :  { %v617_v2 = vadd.f32 %v671_v61, %v607_v0  ;;  %620 = vst.msk [vmem:[#allocation2 + $0x8] sm:$0xff] %vm46_vm0, %v618_v1 }
 0x546   :  { %619 = vst.msk [vmem:[#allocation2] sm:$0xff] %vm46_vm0, %v617_v2 }
 0x547   :  { %803 = shalt.err (!%p800_p4)
}
 0x548   :  { %s815_s8 = smov 128   ;;  %s816_s3 = smov 8  }
 0x549   :  { %632 = dma.vmem_to_hbm [thread:$0]  %s627_s13, 256, %s1016_s9, [#allocation3], %s815_s8, %s815_s8, %s816_s3  }
 0x54a   :  { %812 = dma.done.wait [#allocation3], 256  }
 0x54b   :  { %813 = vsyncadd [#allocation3], 4294967040 }
 0x54c   :  { %636 = vsyncpa [#allocation3], 1 }

</bundles_post_ra>
